<compile_context>
chip_gen: v6e
topology: v6e:2x2x1
jax: 0.10.0
libtpu: 0.0.40
codegen_flags: <defaults>
</compile_context>

<pallas_src>
import functools
import math

import jax
import jax.numpy as jnp
from jax import lax
from jax.experimental import pallas as pl
from jax.experimental.pallas import tpu as pltpu


def _vmem_capacity_bytes():
    """Physical VMEM of the attached TPU (64 MiB v7x, 128 MiB v5e/v6e)."""
    try:
        return int(pltpu.get_tpu_info().vmem_capacity_bytes)
    except Exception:
        return 64 << 20  # conservative fallback (v7x)


def _conv1x1(w, x):
    """1x1 conv as Cin broadcast FMAs on the VPU.

    w: (Cout, Cin) f32 value, x: (Cin, T) f32 value  ->  (Cout, T) f32.
    Cin/Cout are tiny, so the MXU is useless here; broadcast multiplies keep
    the lane-dense spatial axis untouched.
    """
    cin = x.shape[0]
    acc = w[:, 0:1] * x[0:1, :]
    for c in range(1, cin):
        acc = acc + w[:, c:c + 1] * x[c:c + 1, :]
    return acc


# ----------------------------- fused single pass -----------------------------

def _fused_kernel(x_ref, w_ref, gamma_ref, beta_ref, o_ref, y_ref, *, eps, inv_m):
    """Whole activation resident in VMEM: conv -> batch stats -> BN -> ReLU.

    x_ref: (N, Cin, HW); w_ref: (Cout, Cin); gamma/beta: (Cout, 1)
    o_ref: (N, Cout, HW); y_ref: (N, Cout, HW) f32 scratch holding the conv.
    """
    n_batch = x_ref.shape[0]
    cout = w_ref.shape[0]
    w = w_ref[...].astype(jnp.float32)

    # 1) conv into the VMEM scratch, accumulate per-channel sums.
    s = jnp.zeros((cout, 1), jnp.float32)
    for n in range(n_batch):
        y = _conv1x1(w, x_ref[n].astype(jnp.float32))          # (Cout, HW) f32
        y_ref[n] = y
        s = s + jnp.sum(y, axis=-1, keepdims=True)
    mean = s * inv_m                                            # (Cout, 1)

    # 2) centered sum of squares (numerically matches mean((y - mean)^2)).
    ss = jnp.zeros((cout, 1), jnp.float32)
    for n in range(n_batch):
        d = y_ref[n] - mean
        ss = ss + jnp.sum(d * d, axis=-1, keepdims=True)
    inv_std = lax.rsqrt(ss * inv_m + eps)
    scale = gamma_ref[...] * inv_std
    shift = beta_ref[...] - mean * scale

    # 3) affine + ReLU, lane-dense stores.
    for n in range(n_batch):
        o_ref[n] = jnp.maximum(y_ref[n] * scale + shift, 0.0).astype(o_ref.dtype)


# -------------------------- two-pass (HBM streaming) --------------------------

def _stats_kernel(x_ref, stat_ref):
    """Per-sample input statistics for the BN epilogue (no conv, no weight).

    x_ref: (Cin, T) spatial tile of one sample.
    stat_ref: (Cin+1, Cin, 1) resident per-sample accumulator:
        page 0     : S_i  = sum_t x_i(t)
        page 1 + i : G_i. = sum_t x_i(t) * x_.(t)   (Gram row; symmetric)
    sum(y_c) and sum(y_c^2) are recovered from S and G in the JAX epilogue,
    so this pass never touches the conv weight.
    """
    @pl.when(pl.program_id(1) == 0)
    def _():
        stat_ref[...] = jnp.zeros_like(stat_ref)

    x = x_ref[...].astype(jnp.float32)
    cin = x.shape[0]
    stat_ref[0] += jnp.sum(x, axis=-1, keepdims=True)
    for i in range(cin):
        # Full Gram rows for simplicity (only the triangle is strictly needed).
        stat_ref[i + 1] += jnp.sum(x * x[i:i + 1, :], axis=-1, keepdims=True)


def _norm_kernel(x_ref, wf_ref, shift_ref, o_ref):
    """y = W_folded @ x + shift, ReLU.  Lane-dense (Cout, T) stores."""
    y = _conv1x1(wf_ref[...], x_ref[...].astype(jnp.float32)) + shift_ref[...]
    o_ref[...] = jnp.maximum(y, 0.0).astype(o_ref.dtype)


def _pick_tile(hw, cap=32768):
    """Largest multiple-of-128 divisor of H*W up to `cap` lanes (amortizes the
    ~0.35us per-grid-step overhead); falls back to a full-extent block."""
    top = min(hw, cap)
    top -= top % 128
    for t in range(top, 127, -128):
        if hw % t == 0:
            return t
    # TODO(synk): odd H*W with no multiple-of-128 divisor falls back to one
    #             full-extent (masked-store) block per sample.
    return hw


def _buffered_spec(block_shape, index_map, depth):
    """BlockSpec with deeper input pipelining when the kwarg is available."""
    try:
        return pl.BlockSpec(block_shape, index_map, pipeline_mode=pl.Buffered(depth))
    except Exception:
        return pl.BlockSpec(block_shape, index_map)


# ---------------------------------- wrapper ----------------------------------

def conv_bn_relu(x_nchw, weight, gamma, beta, eps=1e-5,
                 force_two_pass=False, max_tile=32768):
    """x_nchw: (N, Cin, H, W); weight: (Cout, Cin, 1, 1); gamma/beta: (Cout,)."""
    N, Cin, H, W = x_nchw.shape
    Cout = weight.shape[0]
    HW = H * W
    inv_m = 1.0 / float(N * HW)          # GLOBAL element count per channel.

    # Zero-copy views: channels on sublanes, spatial on lanes.
    x3 = x_nchw.reshape(N, Cin, HW)
    w2 = weight.reshape(Cout, Cin).astype(jnp.float32)
    gamma2 = gamma.reshape(Cout, 1).astype(jnp.float32)
    beta2 = beta.reshape(Cout, 1).astype(jnp.float32)

    vmem_cap = _vmem_capacity_bytes()
    out_isz = jnp.dtype(x_nchw.dtype).itemsize
    # Fused-path VMEM footprint: x + out (double-buffered by the pipeline),
    # one f32 conv scratch, headroom for op temporaries, small weights/slack.
    fused_need = (2 * N * Cin * HW * 4
                  + 2 * N * Cout * HW * out_isz
                  + N * Cout * HW * 4
                  + 4 * N * Cout * HW * 4
                  + (1 << 20))

    if (not force_two_pass) and fused_need <= int(0.5 * vmem_cap):
        vmem_limit = min(int(0.9 * vmem_cap), max(32 << 20, fused_need + (8 << 20)))
        out3 = pl.pallas_call(
            functools.partial(_fused_kernel, eps=eps, inv_m=inv_m),
            out_shape=jax.ShapeDtypeStruct((N, Cout, HW), x_nchw.dtype),
            grid=(1,),
            in_specs=[
                pl.BlockSpec((N, Cin, HW), lambda i: (0, 0, 0)),
                pl.BlockSpec((Cout, Cin), lambda i: (0, 0)),
                pl.BlockSpec((Cout, 1), lambda i: (0, 0)),
                pl.BlockSpec((Cout, 1), lambda i: (0, 0)),
            ],
            out_specs=pl.BlockSpec((N, Cout, HW), lambda i: (0, 0, 0)),
            scratch_shapes=[pltpu.VMEM((N, Cout, HW), jnp.float32)],
            compiler_params=pltpu.CompilerParams(
                dimension_semantics=("arbitrary",),
                vmem_limit_bytes=vmem_limit,
            ),
        )(x3, w2, gamma2, beta2)
        return out3.reshape(N, Cout, H, W)

    # --------------------------- two-pass fallback ---------------------------
    T = _pick_tile(HW, max_tile)
    num_t = HW // T

    # Pass 1: per-sample S / Gram partials.  Sample axis "parallel" so the
    # stats pass megacore-shards on v7x; the tile axis reduces into the
    # resident per-sample block.
    stats = pl.pallas_call(
        _stats_kernel,
        out_shape=jax.ShapeDtypeStruct((N, Cin + 1, Cin, 1), jnp.float32),
        grid=(N, num_t),
        in_specs=[pl.BlockSpec((None, Cin, T), lambda n, t: (n, 0, t))],
        out_specs=pl.BlockSpec((None, Cin + 1, Cin, 1), lambda n, t: (n, 0, 0, 0)),
        compiler_params=pltpu.CompilerParams(
            dimension_semantics=("parallel", "arbitrary")),
    )(x3)

    # Tiny per-channel BN epilogue in plain JAX (Cin/Cout-sized matrices).
    stats = jnp.sum(stats, axis=0)                   # (Cin+1, Cin, 1)
    s_x = stats[0]                                   # (Cin, 1)   sum(x_i)
    gram = stats[1:, :, 0]                           # (Cin, Cin) sum(x_i x_j)
    sum_y = w2 @ s_x                                 # (Cout, 1)
    sum_y2 = jnp.sum((w2 @ gram) * w2, axis=1, keepdims=True)
    mean = sum_y * inv_m
    # TODO(synk): E[y^2]-E[y]^2 can cancel in f32 for extreme N*H*W / means;
    #             the fused path uses a centered second pass instead.
    var = jnp.maximum(sum_y2 * inv_m - mean * mean, 0.0)
    inv_std = lax.rsqrt(var + eps)
    scale = gamma2 * inv_std
    shift = beta2 - mean * scale
    w_folded = w2 * scale                            # BN scale folded into W

    # Pass 2: y = W_folded @ x + shift, ReLU.  Fully parallel grid, lane-dense
    # stores, 3-deep buffering on the streamed input.
    out3 = pl.pallas_call(
        _norm_kernel,
        out_shape=jax.ShapeDtypeStruct((N, Cout, HW), x_nchw.dtype),
        grid=(N, num_t),
        in_specs=[
            _buffered_spec((None, Cin, T), lambda n, t: (n, 0, t), 3),
            pl.BlockSpec((Cout, Cin), lambda n, t: (0, 0)),
            pl.BlockSpec((Cout, 1), lambda n, t: (0, 0)),
        ],
        out_specs=pl.BlockSpec((None, Cout, T), lambda n, t: (n, 0, t)),
        compiler_params=pltpu.CompilerParams(
            dimension_semantics=("parallel", "parallel")),
    )(x3, w_folded, shift)
    return out3.reshape(N, Cout, H, W)


def _reference(x_nchw, weight, gamma, beta, eps=1e-5):
    """Pure-JAX reference with identical semantics."""
    N, Cin, H, W = x_nchw.shape
    Cout = weight.shape[0]
    x_flat = jnp.transpose(x_nchw, (0, 2, 3, 1)).reshape(-1, Cin)
    y = x_flat @ weight.reshape(Cout, Cin).T
    mean = jnp.mean(y, axis=0, keepdims=True)
    var = jnp.mean((y - mean) ** 2, axis=0, keepdims=True)
    out = (y - mean) / jnp.sqrt(var + eps) * gamma.reshape(1, -1) + beta.reshape(1, -1)
    out = jnp.maximum(out, 0.0)
    return jnp.transpose(out.reshape(N, H, W, Cout), (0, 3, 1, 2))


if __name__ == "__main__":
    # Shapes consistent with Conv_BN_ReLU(in_planes=4, out_planes=8).
    N, Cin, Cout, H, W = 2, 4, 8, 16, 16

    key = jax.random.PRNGKey(0)
    kx, kw = jax.random.split(key)

    x = jax.random.normal(kx, (N, Cin, H, W), dtype=jnp.float32)

    # Conv2d weight init: normal(0, sqrt(2/n)), n = kh*kw*out_planes = Cout.
    std = math.sqrt(2.0 / (1 * 1 * Cout))
    weight = std * jax.random.normal(kw, (Cout, Cin, 1, 1), dtype=jnp.float32)

    # BatchNorm2d init: weight=1, bias=0.
    gamma = jnp.ones((Cout,), dtype=jnp.float32)
    beta = jnp.zeros((Cout,), dtype=jnp.float32)

    ref = _reference(x, weight, gamma, beta)

    # Fused single-pass path (activation fits the VMEM gate at this size).
    out_fused = jax.block_until_ready(conv_bn_relu(x, weight, gamma, beta))
    assert out_fused.shape == (N, Cout, H, W)
    assert jnp.allclose(out_fused, ref, atol=1e-4, rtol=1e-4)

    # Tiled two-pass (HBM-streaming) path, forced with small tiles so the
    # per-sample stats accumulator is exercised across several grid steps.
    out_tiled = jax.block_until_ready(
        conv_bn_relu(x, weight, gamma, beta, force_two_pass=True, max_tile=128))
    assert out_tiled.shape == (N, Cout, H, W)
    assert jnp.allclose(out_tiled, ref, atol=1e-4, rtol=1e-4)

    print("KERNEL_OK")
</pallas_src>

<mosaic_0001>
module attributes {stable_mosaic.version = 11 : i64} {
  func.func @_fused_kernel(%arg0: i32, %arg1: memref<2x4x256xf32, #tpu.memory_space<vmem>>, %arg2: memref<8x4xf32, #tpu.memory_space<vmem>>, %arg3: memref<8x1xf32, #tpu.memory_space<vmem>>, %arg4: memref<8x1xf32, #tpu.memory_space<vmem>>, %arg5: memref<2x8x256xf32, #tpu.memory_space<vmem>>, %arg6: memref<2x8x256xf32, #tpu.memory_space<vmem>>) attributes {dimension_semantics = [#tpu.dimension_semantics<arbitrary>], iteration_bounds = array<i64: 1>, scalar_prefetch = 0 : i64, scratch_operands = 1 : i64, tpu.core_type = #tpu.core_type<tc>, window_params = [{pipeline_mode = #tpu.pipeline_mode<synchronous>, transform_indices = @transform_0, window_bounds = array<i64: 2, 4, 256>}, {pipeline_mode = #tpu.pipeline_mode<synchronous>, transform_indices = @transform_1, window_bounds = array<i64: 8, 4>}, {pipeline_mode = #tpu.pipeline_mode<synchronous>, transform_indices = @transform_2, window_bounds = array<i64: 8, 1>}, {pipeline_mode = #tpu.pipeline_mode<synchronous>, transform_indices = @transform_3, window_bounds = array<i64: 8, 1>}, {pipeline_mode = #tpu.pipeline_mode<synchronous>, transform_indices = @transform_4, window_bounds = array<i64: 2, 8, 256>}]} {
    %c0 = arith.constant 0 : index
    %c0_0 = arith.constant 0 : index
    %0 = vector.load %arg2[%c0, %c0_0] : memref<8x4xf32, #tpu.memory_space<vmem>>, vector<8x4xf32>
    %cst = arith.constant 0.000000e+00 : f32
    %1 = vector.broadcast %cst : f32 to vector<8x1xf32>
    %c0_1 = arith.constant 0 : index
    %c0_2 = arith.constant 0 : index
    %c0_3 = arith.constant 0 : index
    %2 = vector.load %arg1[%c0_1, %c0_2, %c0_3] : memref<2x4x256xf32, #tpu.memory_space<vmem>>, vector<1x4x256xf32>
    %3 = vector.shape_cast %2 : vector<1x4x256xf32> to vector<4x256xf32>
    %4 = vector.extract_strided_slice %0 {offsets = [0, 0], sizes = [8, 1], strides = [1, 1]} : vector<8x4xf32> to vector<8x1xf32>
    %5 = vector.extract_strided_slice %3 {offsets = [0, 0], sizes = [1, 256], strides = [1, 1]} : vector<4x256xf32> to vector<1x256xf32>
    %6 = vector.broadcast %4 : vector<8x1xf32> to vector<8x256xf32>
    %7 = vector.broadcast %5 : vector<1x256xf32> to vector<8x256xf32>
    %8 = arith.mulf %6, %7 : vector<8x256xf32>
    %9 = vector.extract_strided_slice %0 {offsets = [0, 1], sizes = [8, 1], strides = [1, 1]} : vector<8x4xf32> to vector<8x1xf32>
    %10 = vector.extract_strided_slice %3 {offsets = [1, 0], sizes = [1, 256], strides = [1, 1]} : vector<4x256xf32> to vector<1x256xf32>
    %11 = vector.broadcast %9 : vector<8x1xf32> to vector<8x256xf32>
    %12 = vector.broadcast %10 : vector<1x256xf32> to vector<8x256xf32>
    %13 = arith.mulf %11, %12 : vector<8x256xf32>
    %14 = arith.addf %8, %13 : vector<8x256xf32>
    %15 = vector.extract_strided_slice %0 {offsets = [0, 2], sizes = [8, 1], strides = [1, 1]} : vector<8x4xf32> to vector<8x1xf32>
    %16 = vector.extract_strided_slice %3 {offsets = [2, 0], sizes = [1, 256], strides = [1, 1]} : vector<4x256xf32> to vector<1x256xf32>
    %17 = vector.broadcast %15 : vector<8x1xf32> to vector<8x256xf32>
    %18 = vector.broadcast %16 : vector<1x256xf32> to vector<8x256xf32>
    %19 = arith.mulf %17, %18 : vector<8x256xf32>
    %20 = arith.addf %14, %19 : vector<8x256xf32>
    %21 = vector.extract_strided_slice %0 {offsets = [0, 3], sizes = [8, 1], strides = [1, 1]} : vector<8x4xf32> to vector<8x1xf32>
    %22 = vector.extract_strided_slice %3 {offsets = [3, 0], sizes = [1, 256], strides = [1, 1]} : vector<4x256xf32> to vector<1x256xf32>
    %23 = vector.broadcast %21 : vector<8x1xf32> to vector<8x256xf32>
    %24 = vector.broadcast %22 : vector<1x256xf32> to vector<8x256xf32>
    %25 = arith.mulf %23, %24 : vector<8x256xf32>
    %26 = arith.addf %20, %25 : vector<8x256xf32>
    %c0_4 = arith.constant 0 : index
    %c0_5 = arith.constant 0 : index
    %c0_6 = arith.constant 0 : index
    %27 = vector.load %arg6[%c0_4, %c0_5, %c0_6] : memref<2x8x256xf32, #tpu.memory_space<vmem>>, vector<1x8x256xf32>
    %28 = vector.shape_cast %27 : vector<1x8x256xf32> to vector<8x256xf32>
    %29 = vector.shape_cast %26 : vector<8x256xf32> to vector<1x8x256xf32>
    tpu.vector_store %arg6[%c0_4, %c0_5, %c0_6], %29 {strides = array<i32>} : memref<2x8x256xf32, #tpu.memory_space<vmem>>, vector<1x8x256xf32>,
    %cst_7 = arith.constant dense<0.000000e+00> : vector<8xf32>
    %30 = vector.multi_reduction <add>, %26, %cst_7 [1] : vector<8x256xf32> to vector<8xf32>
    %31 = vector.shape_cast %30 : vector<8xf32> to vector<8x1xf32>
    %32 = arith.addf %1, %31 : vector<8x1xf32>
    %c1 = arith.constant 1 : index
    %c0_8 = arith.constant 0 : index
    %c0_9 = arith.constant 0 : index
    %33 = vector.load %arg1[%c1, %c0_8, %c0_9] : memref<2x4x256xf32, #tpu.memory_space<vmem>>, vector<1x4x256xf32>
    %34 = vector.shape_cast %33 : vector<1x4x256xf32> to vector<4x256xf32>
    %35 = vector.extract_strided_slice %0 {offsets = [0, 0], sizes = [8, 1], strides = [1, 1]} : vector<8x4xf32> to vector<8x1xf32>
    %36 = vector.extract_strided_slice %34 {offsets = [0, 0], sizes = [1, 256], strides = [1, 1]} : vector<4x256xf32> to vector<1x256xf32>
    %37 = vector.broadcast %35 : vector<8x1xf32> to vector<8x256xf32>
    %38 = vector.broadcast %36 : vector<1x256xf32> to vector<8x256xf32>
    %39 = arith.mulf %37, %38 : vector<8x256xf32>
    %40 = vector.extract_strided_slice %0 {offsets = [0, 1], sizes = [8, 1], strides = [1, 1]} : vector<8x4xf32> to vector<8x1xf32>
    %41 = vector.extract_strided_slice %34 {offsets = [1, 0], sizes = [1, 256], strides = [1, 1]} : vector<4x256xf32> to vector<1x256xf32>
    %42 = vector.broadcast %40 : vector<8x1xf32> to vector<8x256xf32>
    %43 = vector.broadcast %41 : vector<1x256xf32> to vector<8x256xf32>
    %44 = arith.mulf %42, %43 : vector<8x256xf32>
    %45 = arith.addf %39, %44 : vector<8x256xf32>
    %46 = vector.extract_strided_slice %0 {offsets = [0, 2], sizes = [8, 1], strides = [1, 1]} : vector<8x4xf32> to vector<8x1xf32>
    %47 = vector.extract_strided_slice %34 {offsets = [2, 0], sizes = [1, 256], strides = [1, 1]} : vector<4x256xf32> to vector<1x256xf32>
    %48 = vector.broadcast %46 : vector<8x1xf32> to vector<8x256xf32>
    %49 = vector.broadcast %47 : vector<1x256xf32> to vector<8x256xf32>
    %50 = arith.mulf %48, %49 : vector<8x256xf32>
    %51 = arith.addf %45, %50 : vector<8x256xf32>
    %52 = vector.extract_strided_slice %0 {offsets = [0, 3], sizes = [8, 1], strides = [1, 1]} : vector<8x4xf32> to vector<8x1xf32>
    %53 = vector.extract_strided_slice %34 {offsets = [3, 0], sizes = [1, 256], strides = [1, 1]} : vector<4x256xf32> to vector<1x256xf32>
    %54 = vector.broadcast %52 : vector<8x1xf32> to vector<8x256xf32>
    %55 = vector.broadcast %53 : vector<1x256xf32> to vector<8x256xf32>
    %56 = arith.mulf %54, %55 : vector<8x256xf32>
    %57 = arith.addf %51, %56 : vector<8x256xf32>
    %c1_10 = arith.constant 1 : index
    %c0_11 = arith.constant 0 : index
    %c0_12 = arith.constant 0 : index
    %58 = vector.load %arg6[%c1_10, %c0_11, %c0_12] : memref<2x8x256xf32, #tpu.memory_space<vmem>>, vector<1x8x256xf32>
    %59 = vector.shape_cast %58 : vector<1x8x256xf32> to vector<8x256xf32>
    %60 = vector.shape_cast %57 : vector<8x256xf32> to vector<1x8x256xf32>
    tpu.vector_store %arg6[%c1_10, %c0_11, %c0_12], %60 {strides = array<i32>} : memref<2x8x256xf32, #tpu.memory_space<vmem>>, vector<1x8x256xf32>,
    %cst_13 = arith.constant dense<0.000000e+00> : vector<8xf32>
    %61 = vector.multi_reduction <add>, %57, %cst_13 [1] : vector<8x256xf32> to vector<8xf32>
    %62 = vector.shape_cast %61 : vector<8xf32> to vector<8x1xf32>
    %63 = arith.addf %32, %62 : vector<8x1xf32>
    %cst_14 = arith.constant 0.001953125 : f32
    %64 = vector.broadcast %cst_14 : f32 to vector<8x1xf32>
    %65 = arith.mulf %63, %64 : vector<8x1xf32>
    %cst_15 = arith.constant 0.000000e+00 : f32
    %66 = vector.broadcast %cst_15 : f32 to vector<8x1xf32>
    %c0_16 = arith.constant 0 : index
    %c0_17 = arith.constant 0 : index
    %c0_18 = arith.constant 0 : index
    %67 = vector.load %arg6[%c0_16, %c0_17, %c0_18] : memref<2x8x256xf32, #tpu.memory_space<vmem>>, vector<1x8x256xf32>
    %68 = vector.shape_cast %67 : vector<1x8x256xf32> to vector<8x256xf32>
    %69 = vector.broadcast %65 : vector<8x1xf32> to vector<8x256xf32>
    %70 = arith.subf %68, %69 : vector<8x256xf32>
    %71 = arith.mulf %70, %70 : vector<8x256xf32>
    %cst_19 = arith.constant dense<0.000000e+00> : vector<8xf32>
    %72 = vector.multi_reduction <add>, %71, %cst_19 [1] : vector<8x256xf32> to vector<8xf32>
    %73 = vector.shape_cast %72 : vector<8xf32> to vector<8x1xf32>
    %74 = arith.addf %66, %73 : vector<8x1xf32>
    %c1_20 = arith.constant 1 : index
    %c0_21 = arith.constant 0 : index
    %c0_22 = arith.constant 0 : index
    %75 = vector.load %arg6[%c1_20, %c0_21, %c0_22] : memref<2x8x256xf32, #tpu.memory_space<vmem>>, vector<1x8x256xf32>
    %76 = vector.shape_cast %75 : vector<1x8x256xf32> to vector<8x256xf32>
    %77 = vector.broadcast %65 : vector<8x1xf32> to vector<8x256xf32>
    %78 = arith.subf %76, %77 : vector<8x256xf32>
    %79 = arith.mulf %78, %78 : vector<8x256xf32>
    %cst_23 = arith.constant dense<0.000000e+00> : vector<8xf32>
    %80 = vector.multi_reduction <add>, %79, %cst_23 [1] : vector<8x256xf32> to vector<8xf32>
    %81 = vector.shape_cast %80 : vector<8xf32> to vector<8x1xf32>
    %82 = arith.addf %74, %81 : vector<8x1xf32>
    %cst_24 = arith.constant 0.001953125 : f32
    %83 = vector.broadcast %cst_24 : f32 to vector<8x1xf32>
    %84 = arith.mulf %82, %83 : vector<8x1xf32>
    %cst_25 = arith.constant 9.99999974E-6 : f32
    %85 = vector.broadcast %cst_25 : f32 to vector<8x1xf32>
    %86 = arith.addf %84, %85 : vector<8x1xf32>
    %87 = math.rsqrt %86 : vector<8x1xf32>
    %c0_26 = arith.constant 0 : index
    %c0_27 = arith.constant 0 : index
    %88 = vector.load %arg3[%c0_26, %c0_27] : memref<8x1xf32, #tpu.memory_space<vmem>>, vector<8x1xf32>
    %89 = arith.mulf %88, %87 : vector<8x1xf32>
    %c0_28 = arith.constant 0 : index
    %c0_29 = arith.constant 0 : index
    %90 = vector.load %arg4[%c0_28, %c0_29] : memref<8x1xf32, #tpu.memory_space<vmem>>, vector<8x1xf32>
    %91 = arith.mulf %65, %89 : vector<8x1xf32>
    %92 = arith.subf %90, %91 : vector<8x1xf32>
    %c0_30 = arith.constant 0 : index
    %c0_31 = arith.constant 0 : index
    %c0_32 = arith.constant 0 : index
    %93 = vector.load %arg6[%c0_30, %c0_31, %c0_32] : memref<2x8x256xf32, #tpu.memory_space<vmem>>, vector<1x8x256xf32>
    %94 = vector.shape_cast %93 : vector<1x8x256xf32> to vector<8x256xf32>
    %95 = vector.broadcast %89 : vector<8x1xf32> to vector<8x256xf32>
    %96 = arith.mulf %94, %95 : vector<8x256xf32>
    %97 = vector.broadcast %92 : vector<8x1xf32> to vector<8x256xf32>
    %98 = arith.addf %96, %97 : vector<8x256xf32>
    %cst_33 = arith.constant 0.000000e+00 : f32
    %99 = vector.broadcast %cst_33 : f32 to vector<8x256xf32>
    %100 = arith.maximumf %98, %99 : vector<8x256xf32>
    %c0_34 = arith.constant 0 : index
    %c0_35 = arith.constant 0 : index
    %c0_36 = arith.constant 0 : index
    %101 = vector.load %arg5[%c0_34, %c0_35, %c0_36] : memref<2x8x256xf32, #tpu.memory_space<vmem>>, vector<1x8x256xf32>
    %102 = vector.shape_cast %101 : vector<1x8x256xf32> to vector<8x256xf32>
    %103 = vector.shape_cast %100 : vector<8x256xf32> to vector<1x8x256xf32>
    tpu.vector_store %arg5[%c0_34, %c0_35, %c0_36], %103 {strides = array<i32>} : memref<2x8x256xf32, #tpu.memory_space<vmem>>, vector<1x8x256xf32>,
    %c1_37 = arith.constant 1 : index
    %c0_38 = arith.constant 0 : index
    %c0_39 = arith.constant 0 : index
    %104 = vector.load %arg6[%c1_37, %c0_38, %c0_39] : memref<2x8x256xf32, #tpu.memory_space<vmem>>, vector<1x8x256xf32>
    %105 = vector.shape_cast %104 : vector<1x8x256xf32> to vector<8x256xf32>
    %106 = vector.broadcast %89 : vector<8x1xf32> to vector<8x256xf32>
    %107 = arith.mulf %105, %106 : vector<8x256xf32>
    %108 = vector.broadcast %92 : vector<8x1xf32> to vector<8x256xf32>
    %109 = arith.addf %107, %108 : vector<8x256xf32>
    %cst_40 = arith.constant 0.000000e+00 : f32
    %110 = vector.broadcast %cst_40 : f32 to vector<8x256xf32>
    %111 = arith.maximumf %109, %110 : vector<8x256xf32>
    %c1_41 = arith.constant 1 : index
    %c0_42 = arith.constant 0 : index
    %c0_43 = arith.constant 0 : index
    %112 = vector.load %arg5[%c1_41, %c0_42, %c0_43] : memref<2x8x256xf32, #tpu.memory_space<vmem>>, vector<1x8x256xf32>
    %113 = vector.shape_cast %112 : vector<1x8x256xf32> to vector<8x256xf32>
    %114 = vector.shape_cast %111 : vector<8x256xf32> to vector<1x8x256xf32>
    tpu.vector_store %arg5[%c1_41, %c0_42, %c0_43], %114 {strides = array<i32>} : memref<2x8x256xf32, #tpu.memory_space<vmem>>, vector<1x8x256xf32>,
    return
  }
  func.func @transform_0(%arg0: i32) -> (i32, i32, i32) {
    %c0_i32 = arith.constant 0 : i32
    %c0_i32_0 = arith.constant 0 : i32
    %c0_i32_1 = arith.constant 0 : i32
    %c0_i32_2 = arith.constant 0 : i32
    return %c0_i32, %c0_i32_0, %c0_i32_1 : i32, i32, i32
  }
  func.func @transform_1(%arg0: i32) -> (i32, i32) {
    %c0_i32 = arith.constant 0 : i32
    %c0_i32_0 = arith.constant 0 : i32
    %c0_i32_1 = arith.constant 0 : i32
    return %c0_i32, %c0_i32_0 : i32, i32
  }
  func.func @transform_2(%arg0: i32) -> (i32, i32) {
    %c0_i32 = arith.constant 0 : i32
    %c0_i32_0 = arith.constant 0 : i32
    %c0_i32_1 = arith.constant 0 : i32
    return %c0_i32, %c0_i32_0 : i32, i32
  }
  func.func @transform_3(%arg0: i32) -> (i32, i32) {
    %c0_i32 = arith.constant 0 : i32
    %c0_i32_0 = arith.constant 0 : i32
    %c0_i32_1 = arith.constant 0 : i32
    return %c0_i32, %c0_i32_0 : i32, i32
  }
  func.func @transform_4(%arg0: i32) -> (i32, i32, i32) {
    %c0_i32 = arith.constant 0 : i32
    %c0_i32_0 = arith.constant 0 : i32
    %c0_i32_1 = arith.constant 0 : i32
    %c0_i32_2 = arith.constant 0 : i32
    return %c0_i32, %c0_i32_0, %c0_i32_1 : i32, i32, i32
  }
}

</mosaic_0001>

<bundles_post_ra>
// kernel: tpu_custom_call.1
= control target key start
LH: loop header
LB: loop body
LE: loop exit
PB: predicated region body
PF: predicated region fallthrough
CT: control target
= control target key end

     0   :  { %v338_v1 = vmov 0   ;;  %v339_v2 = vmov 2   ;;  %s388_s0 = inlined_call_operand.vmem [shape: f32[2,4,256], index: 0, kind: input, shape index: {}]   ;;  %s389_s1 = inlined_call_operand.vmem [shape: f32[8,4], index: 1, kind: input, shape index: {}]   ;;  %s390_s2 = inlined_call_operand.vmem [shape: f32[8,1], index: 2, kind: input, shape index: {}]   ;;  %s391_s3 = inlined_call_operand.vmem [shape: f32[8,1], index: 3, kind: input, shape index: {}]   ;;  %s392_s4 = inlined_call_operand.hbm [shape: f32[2,8,256], index: 4, kind: output, shape index: {}]  }
   0x1   :  { %v18_v0 = vld [vmem:[%s389_s1] sm:$0xff]  ;;  %308 = vset.pattern.permute.xlu0 %v338_v1  ;;  %310 = vset.pattern.permute.xlu1 %v339_v2 }
   0x2   :  { %9 = vsyncpa [#allocation4], 0  ;;  %22 = vperm.xlu0 %308, %v18_v0   ;;  %73 = vperm.xlu1 %310, %v18_v0   ;;  %v340_v3 = vmov 1   ;;  %v341_v4 = vmov 3   ;;  %v26_v5 = vlaneseq  ;;  %v19_v9 = vld [vmem:[%s388_s0] sm:$0xff]  ;;  %v300_v10 = vld [vmem:[%s388_s0 + $0x8] sm:$0xff] }
   0x3   :  { %s342_s23 = smov [#allocation3]  }
   0x4   :  { %v27_v6 = vshrl.u32 %v26_v5, 7  ;;  %s289_s24 = sshll.u32 %s342_s23, 4  ;;  %s290_s24 = int_to_ptr.vmem [resolvable:$true] %s289_s24 }
   0x5   :  { %p321_p1 = scmp.lt.s32.totalorder %s290_s24, %s290_s24 }
   0x6   :  { %309 = vset.pattern.permute.xlu0 %v340_v3  ;;  %311 = vset.pattern.permute.xlu1 %v341_v4  ;;  %v28_v7 = vsub.s32 0, %v27_v6  ;;  %v32_v8 = vsub.s32 4, %v27_v6  ;;  %v78_v11 = vsub.s32 2, %v27_v6  ;;  %v82_v12 = vsub.s32 6, %v27_v6 }
   0x7   :  { %47 = vperm.xlu0 %309, %v18_v0   ;;  %99 = vperm.xlu1 %311, %v18_v0   ;;  %v52_v13 = vsub.s32 1, %v27_v6  ;;  %v56_v14 = vsub.s32 5, %v27_v6  ;;  %v104_v15 = vsub.s32 3, %v27_v6  ;;  %v108_v16 = vsub.s32 7, %v27_v6 }
   0x8   :  { %v29_v17 = vrot.slane %v19_v9, %v28_v7  ;;  %v33_v18 = vrot.slane %v19_v9, %v32_v8  ;;  %v136_v19 = vrot.slane %v300_v10, %v28_v7  ;;  %v140_v20 = vrot.slane %v300_v10, %v32_v8 }
   0x9   :  { %v79_v21 = vrot.slane %v19_v9, %v78_v11  ;;  %v83_v22 = vrot.slane %v19_v9, %v82_v12  ;;  %v178_v23 = vrot.slane %v300_v10, %v78_v11  ;;  %v182_v24 = vrot.slane %v300_v10, %v82_v12 }
   0xa   :  { %v53_v25 = vrot.slane %v19_v9, %v52_v13  ;;  %v57_v26 = vrot.slane %v19_v9, %v56_v14  ;;  %v156_v27 = vrot.slane %v300_v10, %v52_v13  ;;  %v160_v28 = vrot.slane %v300_v10, %v56_v14 }
   0xb   :  { %312 = vset.pattern.permute.xlu0 %v338_v1  ;;  %313 = vset.pattern.permute.xlu1 %v338_v1  ;;  %v105_v29 = vrot.slane %v19_v9, %v104_v15  ;;  %v109_v30 = vrot.slane %v19_v9, %v108_v16  ;;  %v200_v31 = vrot.slane %v300_v10, %v104_v15 }
   0xc   :  { %v204_v32 = vrot.slane %v300_v10, %v108_v16  ;;  %v39_v33 = vrot.slane %v29_v17, %v28_v7  ;;  %v43_v34 = vrot.slane %v33_v18, %v28_v7  ;;  %v146_v35 = vrot.slane %v136_v19, %v28_v7 }
   0xd   :  { %v150_v36 = vrot.slane %v140_v20, %v28_v7  ;;  %v89_v39 = vrot.slane %v79_v21, %v78_v11  ;;  %v93_v40 = vrot.slane %v83_v22, %v78_v11  ;;  %v188_v41 = vrot.slane %v178_v23, %v78_v11 }
   0xe   :  { %v192_v42 = vrot.slane %v182_v24, %v78_v11  ;;  %v63_v43 = vrot.slane %v53_v25, %v52_v13  ;;  %v67_v44 = vrot.slane %v57_v26, %v52_v13  ;;  %v166_v45 = vrot.slane %v156_v27, %v52_v13 }
   0xf   :  { %v170_v46 = vrot.slane %v160_v28, %v52_v13  ;;  %v115_v47 = vrot.slane %v105_v29, %v104_v15  ;;  %v119_v48 = vrot.slane %v109_v30, %v104_v15  ;;  %v210_v49 = vrot.slane %v200_v31, %v104_v15 }
  0x10   :  { %v214_v50 = vrot.slane %v204_v32, %v104_v15 }
  0x7d   :  { %v23_v37 = vpop.permute.xlu0 %22  ;;  %v74_v38 = vpop.permute.xlu1 %73 }
  0x7e   :  { %v44_v51 = vmul.f32 %v39_v33, %v23_v37  ;;  %v45_v52 = vmul.f32 %v43_v34, %v23_v37  ;;  %v151_v53 = vmul.f32 %v146_v35, %v23_v37  ;;  %v152_v54 = vmul.f32 %v150_v36, %v23_v37 }
  0x7f   :  { %v94_v55 = vmul.f32 %v89_v39, %v74_v38  ;;  %v95_v56 = vmul.f32 %v93_v40, %v74_v38  ;;  %v193_v57 = vmul.f32 %v188_v41, %v74_v38  ;;  %v194_v58 = vmul.f32 %v192_v42, %v74_v38  ;;  %v250_v38 = vld [vmem:[%s390_s2] sm:$0xff]  ;;  %s316_s2 = scalar_lea.vmem %s290_s24, 512 }
  0x80   :  { %v252_v41 = vld [vmem:[%s391_s3] sm:$0xff]  ;;  %p317_p0 = scmp.ne.s32.totalorder %s290_s24, %s316_s2  ;;  %p322_p2 = scmp.lt.s32.totalorder %s316_s2, %s316_s2 }
  0x82   :  { %v48_v59 = vpop.permute.xlu0 %47  ;;  %v100_v60 = vpop.permute.xlu1 %99  ;;  %p323_p3 = por %p322_p2, %p321_p1 }
  0x83   :  { %v68_v61 = vmul.f32 %v63_v43, %v48_v59  ;;  %v69_v62 = vmul.f32 %v67_v44, %v48_v59  ;;  %v171_v63 = vmul.f32 %v166_v45, %v48_v59  ;;  %v172_v0 = vmul.f32 %v170_v46, %v48_v59 }
  0x84   :  { %v120_v1 = vmul.f32 %v115_v47, %v100_v60  ;;  %v121_v2 = vmul.f32 %v119_v48, %v100_v60  ;;  %v215_v3 = vmul.f32 %v210_v49, %v100_v60  ;;  %v216_v4 = vmul.f32 %v214_v50, %v100_v60  ;;  %p324_p4 = pnand %p323_p3, %p317_p0 }
  0x85   :  { %v70_v5 = vadd.f32 %v68_v61, %v44_v51  ;;  %v71_v6 = vadd.f32 %v69_v62, %v45_v52  ;;  %v173_v7 = vadd.f32 %v171_v63, %v151_v53  ;;  %v174_v8 = vadd.f32 %v172_v0, %v152_v54 }
  0x87   :  { %v195_v9 = vadd.f32 %v193_v57, %v173_v7  ;;  %v196_v10 = vadd.f32 %v194_v58, %v174_v8  ;;  %v96_v11 = vadd.f32 %v94_v55, %v70_v5  ;;  %v97_v12 = vadd.f32 %v95_v56, %v71_v6 }
  0x89   :  { %v217_v13 = vadd.f32 %v215_v3, %v195_v9  ;;  %v218_v14 = vadd.f32 %v216_v4, %v196_v10  ;;  %v122_v15 = vadd.f32 %v120_v1, %v96_v11  ;;  %v123_v16 = vadd.f32 %v121_v2, %v97_v12 }
  0x8b   :  { %v222_v17 = vadd.f32 %v218_v14, %v217_v13  ;;  %v126_v18 = vadd.f32 %v123_v16, %v122_v15 }
  0x8d   :  { %223 = vadd.xlane.f32.xlu0 %v222_v17  ;;  %127 = vadd.xlane.f32.xlu1 %v126_v18 }
 0x116   :  { %v224_v19 = vpop.xlane.xlu0 %223  ;;  %v128_v20 = vpop.xlane.xlu1 %127 }
 0x117   :  { %v225_v21 = vadd.f32 %v224_v19, %v128_v20 }
 0x119   :  { %v226_v22 = vmul.f32 0.001953125, %v225_v21 }
 0x11b   :  { %v239_v23 = vsub.f32 %v217_v13, %v226_v22  ;;  %v240_v24 = vsub.f32 %v218_v14, %v226_v22  ;;  %v229_v25 = vsub.f32 %v122_v15, %v226_v22  ;;  %v230_v26 = vsub.f32 %v123_v16, %v226_v22 }
 0x11d   :  { %v241_v27 = vmul.f32 %v239_v23, %v239_v23  ;;  %v242_v28 = vmul.f32 %v240_v24, %v240_v24  ;;  %v231_v29 = vmul.f32 %v229_v25, %v229_v25  ;;  %v232_v30 = vmul.f32 %v230_v26, %v230_v26 }
 0x11f   :  { %v243_v31 = vadd.f32 %v242_v28, %v241_v27  ;;  %v233_v32 = vadd.f32 %v232_v30, %v231_v29 }
 0x121   :  { %244 = vadd.xlane.f32.xlu1 %v243_v31  ;;  %234 = vadd.xlane.f32.xlu0 %v233_v32 }
 0x1aa   :  { %v245_v33 = vpop.xlane.xlu1 %244  ;;  %v235_v34 = vpop.xlane.xlu0 %234 }
 0x1ab   :  { %v246_v35 = vadd.f32 %v245_v33, %v235_v34 }
 0x1ad   :  { %v247_v36 = vmul.f32 0.001953125, %v246_v35 }
 0x1af   :  { %v248_v37 = vadd.f32 1e-05, %v247_v36 }
 0x1b1   :  { %314 = vrsqrt.f32 %v248_v37 }
 0x1be   :  { %v315_v39 = vpop.eup %314 }
 0x1bf   :  { %v251_v40 = vmul.f32 %v315_v39, %v250_v38 }
 0x1c1   :  { %257 = vperm.xlu0 %312, %v251_v40   ;;  %v253_v42 = vmul.f32 %v251_v40, %v226_v22 }
 0x1c3   :  { %v254_v43 = vsub.f32 %v252_v41, %v253_v42 }
 0x1c5   :  { %264 = vperm.xlu1 %313, %v254_v43  }
 0x23c   :  { %v258_v44 = vpop.permute.xlu0 %257 }
 0x23d   :  { %v260_v45 = vmul.f32 %v258_v44, %v122_v15  ;;  %v261_v46 = vmul.f32 %v258_v44, %v123_v16  ;;  %v275_v47 = vmul.f32 %v258_v44, %v217_v13  ;;  %v276_v48 = vmul.f32 %v258_v44, %v218_v14 }
 0x240   :  { %v265_v49 = vpop.permute.xlu1 %264 }
 0x241   :  { %v267_v50 = vadd.f32 %v265_v49, %v260_v45  ;;  %v268_v51 = vadd.f32 %v265_v49, %v261_v46  ;;  %v277_v52 = vadd.f32 %v275_v47, %v265_v49  ;;  %v278_v53 = vadd.f32 %v276_v48, %v265_v49 }
 0x243   :  { %v269_v54 = vmax.f32 %v267_v50, 0.0  ;;  %v270_v55 = vmax.f32 %v268_v51, 0.0  ;;  %v279_v56 = vmax.f32 %v277_v52, 0.0  ;;  %v280_v57 = vmax.f32 %v278_v53, 0.0 }
 0x245   :  { %271 = vst [vmem:[#allocation3] sm:$0xff] %v269_v54  ;;  %272 = vst [vmem:[#allocation3 + $0x8] sm:$0xff] %v270_v55 }
 0x246   :  { %282 = vst [vmem:[#allocation3 + $0x10] sm:$0xff] %v279_v56  ;;  %283 = vst [vmem:[#allocation3 + $0x18] sm:$0xff] %v280_v57 }
 0x247   :  { %327 = shalt.err (!%p324_p4)
}
 0x248   :  { %s343_s3 = smov 256   ;;  %s344_s25 = smov 16  }
 0x249   :  { %295 = dma.vmem_to_hbm [thread:$0]  %s290_s24, 512, %s392_s4, [#allocation4], %s343_s3, %s343_s3, %s344_s25  }
 0x24a   :  { %336 = dma.done.wait [#allocation4], 512  }
 0x24b   :  { %337 = vsyncadd [#allocation4], 4294966784 }
 0x24c   :  { %299 = vsyncpa [#allocation4], 1 }

</bundles_post_ra>
